<compile_context>
chip_gen: v6e
topology: v6e:2x2x1
jax: 0.10.0
libtpu: 0.0.40
codegen_flags: <defaults>
</compile_context>

<pallas_src>
import jax
import jax.numpy as jnp
from jax.experimental import pallas as pl
from jax.experimental.pallas import tpu as pltpu


_VMEM_LIMIT = 32 * 1024 * 1024          # explicit scoped-VMEM budget (all gens)
_BLOCK_ELEM_BUDGET = (4 * 1024 * 1024) // 4   # ~4 MiB f32-equivalent per block
_FUSED_VMEM_BUDGET = 20 * 1024 * 1024   # gate for the single-kernel fused path


def _round_up(a, b):
    return ((a + b - 1) // b) * b


def _fused_fits(N, C, L, itemsize):
    elems = N * _round_up(C, 8) * _round_up(L, 128)
    # x in + y out (double-buffered) + a few f32 temporaries, conservatively.
    return elems * (4 * itemsize + 16) <= _FUSED_VMEM_BUDGET


def _choose_tiles(R, L, itemsize):
    """Dtype-aware, shape-robust tile selection for the tiled two-pass path."""
    unit_r = {4: 8, 2: 16, 1: 32}.get(itemsize, 8)

    # Row tile: <=512 rows, and split into >=2 row blocks when possible so the
    # "parallel" row axis feeds both v7x TensorCores.
    r_full = _round_up(R, unit_r)
    r_tile = min(r_full, 512)
    half = _round_up((R + 1) // 2, unit_r)
    if half < r_full:
        r_tile = min(r_tile, half)
    if r_tile >= R:
        r_tile = R                       # full dim is always a legal block dim

    # Lane tile: as wide as the ~4 MiB (f32-equiv) block budget allows, capped
    # at 8192 lanes; full L when it fits (also covers L not multiple of 128).
    l_cap = max(128, (_BLOCK_ELEM_BUDGET // max(r_tile, 1)) // 128 * 128)
    l_tile = min(l_cap, 8192, _round_up(L, 128))
    if l_tile >= L:
        l_tile = L
    return r_tile, l_tile


# ----------------------------------------------------------------------------
# Fused single-kernel path (x resident in VMEM): 1 read + 1 write of x.
# ----------------------------------------------------------------------------
def _make_fused_kernel(N, C, L, momentum, eps):
    count = float(N * L)

    def kernel(x_ref, p_ref, y_ref, stats_ref):
        x = x_ref[...].astype(jnp.float32)          # (N, C, L)
        p = p_ref[...]                              # (4, C, 1) f32
        k = p[0:1]                                  # source_mean (1, C, 1)
        src_var = p[1:2]
        w = p[2:3]
        b = p[3:4]

        xs = x - k                                  # shifted for stability
        s1 = jnp.sum(jnp.sum(xs, axis=2, keepdims=True), axis=0,
                     keepdims=True) / count         # (1, C, 1)  E[x - k]
        s2 = jnp.sum(jnp.sum(xs * xs, axis=2, keepdims=True), axis=0,
                     keepdims=True) / count         # (1, C, 1)  E[(x - k)^2]
        b_mean = k + s1
        b_var = s2 - s1 * s1

        mean = (1.0 - momentum) * k + momentum * b_mean
        var = (1.0 - momentum) * src_var + momentum * b_var
        inv_std = jax.lax.rsqrt(var + eps)
        scale = inv_std * w
        shift = b - mean * scale

        y_ref[...] = (x * scale + shift).astype(y_ref.dtype)
        stats_ref[0:1] = mean
        stats_ref[1:2] = var

    return kernel


# ----------------------------------------------------------------------------
# Tiled pass 1: per-row [sum(x-k), sum((x-k)^2)] with lane-partial scratch.
# ----------------------------------------------------------------------------
def _make_stats_kernel(r_tile, l_tile, L):
    lane_chunks = l_tile // 128 if (l_tile % 128 == 0) else 0
    need_mask = (L % l_tile) != 0

    def kernel(x_ref, k_ref, stats_ref, s1_ref, s2_ref):
        j = pl.program_id(1)

        @pl.when(j == 0)
        def _zero():
            s1_ref[...] = jnp.zeros_like(s1_ref)
            s2_ref[...] = jnp.zeros_like(s2_ref)

        k = k_ref[...]                              # (r_tile, 1) f32

        if lane_chunks:
            if need_mask:
                lane_base = jax.lax.broadcasted_iota(
                    jnp.int32, (r_tile, 128), 1)
            part1 = jnp.zeros((r_tile, 128), jnp.float32)
            part2 = jnp.zeros((r_tile, 128), jnp.float32)
            for c in range(lane_chunks):
                blk = x_ref[:, c * 128:(c + 1) * 128].astype(jnp.float32) - k
                if need_mask:
                    lane = j * l_tile + c * 128 + lane_base
                    blk = jnp.where(lane < L, blk, 0.0)
                part1 = part1 + blk
                part2 = part2 + blk * blk
            # One RMW of the resident lane-partial scratch per grid step.
            s1_ref[...] += part1
            s2_ref[...] += part2

            # Cross-lane reduce + narrow store only once per row block.
            @pl.when(j == pl.num_programs(1) - 1)
            def _finalize():
                stats_ref[:, 0:1] = jnp.sum(s1_ref[...], axis=1, keepdims=True)
                stats_ref[:, 1:2] = jnp.sum(s2_ref[...], axis=1, keepdims=True)
        else:
            # Single lane block whose width equals L (L not a multiple of 128).
            xs = x_ref[...].astype(jnp.float32) - k
            stats_ref[:, 0:1] = jnp.sum(xs, axis=1, keepdims=True)
            stats_ref[:, 1:2] = jnp.sum(xs * xs, axis=1, keepdims=True)

    return kernel


# ----------------------------------------------------------------------------
# Tiled pass 2: y = x * scale + shift (folded per-row table).
# ----------------------------------------------------------------------------
def _norm_kernel(x_ref, ss_ref, y_ref):
    x = x_ref[...].astype(jnp.float32)
    y = x * ss_ref[:, 0:1] + ss_ref[:, 1:2]
    y_ref[...] = y.astype(y_ref.dtype)


def momentum_bn_forward(x, source_mean, source_var, weight, bias,
                        *, momentum, eps):
    """x: (N, C, H, W).  Returns (y, new_mean, new_var)."""
    N, C, H, W = x.shape
    R = N * C
    L = H * W
    itemsize = jnp.dtype(x.dtype).itemsize
    momentum = float(momentum)
    eps = float(eps)

    src_mean = source_mean.astype(jnp.float32)
    src_var = source_var.astype(jnp.float32)
    w32 = weight.astype(jnp.float32)
    b32 = bias.astype(jnp.float32)

    # ---- Fused single-kernel path (small tensors: 2x HBM traffic only) ------
    if _fused_fits(N, C, L, itemsize):
        x3 = x.reshape(N, C, L)
        params = jnp.stack([src_mean, src_var, w32, b32], axis=0)[:, :, None]
        y3, stats = pl.pallas_call(
            _make_fused_kernel(N, C, L, momentum, eps),
            out_shape=(jax.ShapeDtypeStruct((N, C, L), x.dtype),
                       jax.ShapeDtypeStruct((2, C, 1), jnp.float32)),
            grid=(1,),
            in_specs=[pl.BlockSpec((N, C, L), lambda i: (0, 0, 0)),
                      pl.BlockSpec((4, C, 1), lambda i: (0, 0, 0))],
            out_specs=(pl.BlockSpec((N, C, L), lambda i: (0, 0, 0)),
                       pl.BlockSpec((2, C, 1), lambda i: (0, 0, 0))),
            compiler_params=pltpu.CompilerParams(
                vmem_limit_bytes=_VMEM_LIMIT),
            cost_estimate=pl.CostEstimate(
                flops=8 * R * L, transcendentals=C,
                bytes_accessed=2 * R * L * itemsize),
        )(x3, params)
        y = y3.reshape(N, C, H, W)
        return y, stats[0, :, 0], stats[1, :, 0]

    # ---- Tiled two-pass path -------------------------------------------------
    x2 = x.reshape(R, L)                           # zero-copy view
    r_tile, l_tile = _choose_tiles(R, L, itemsize)
    grid = (pl.cdiv(R, r_tile), pl.cdiv(L, l_tile))

    # Per-row shift table (= source mean of that row's channel) for stability.
    k_rows = jnp.tile(src_mean, N).reshape(R, 1)

    # Pass 1: per-row [sum(x-k), sum((x-k)^2)].
    stats = pl.pallas_call(
        _make_stats_kernel(r_tile, l_tile, L),
        out_shape=jax.ShapeDtypeStruct((R, 2), jnp.float32),
        grid=grid,
        in_specs=[pl.BlockSpec((r_tile, l_tile), lambda i, j: (i, j)),
                  pl.BlockSpec((r_tile, 1), lambda i, j: (i, 0))],
        out_specs=pl.BlockSpec((r_tile, 2), lambda i, j: (i, 0)),
        scratch_shapes=[pltpu.VMEM((r_tile, 128), jnp.float32),
                        pltpu.VMEM((r_tile, 128), jnp.float32)],
        compiler_params=pltpu.CompilerParams(
            dimension_semantics=("parallel", "arbitrary"),
            vmem_limit_bytes=_VMEM_LIMIT),
        cost_estimate=pl.CostEstimate(
            flops=5 * R * L, transcendentals=0,
            bytes_accessed=R * L * itemsize + R * (2 + 1) * 4),
    )(x2, k_rows)

    # Tiny C-sized combine / blend / fold (negligible, stays in plain JAX).
    per_channel = stats.reshape(N, C, 2).sum(axis=0)        # (C, 2)
    count = float(N * L)
    d_mean = per_channel[:, 0] / count                      # E[x] - k
    b_mean = src_mean + d_mean
    b_var = per_channel[:, 1] / count - d_mean * d_mean     # biased (ddof=0)

    mean = (1.0 - momentum) * src_mean + momentum * b_mean
    var = (1.0 - momentum) * src_var + momentum * b_var

    inv_std = jax.lax.rsqrt(var + eps)
    scale = inv_std * w32
    shift = b32 - mean * scale
    ss = jnp.stack([jnp.tile(scale, N), jnp.tile(shift, N)], axis=1)  # (R, 2)

    # Pass 2: y = x*scale + shift.
    y2 = pl.pallas_call(
        _norm_kernel,
        out_shape=jax.ShapeDtypeStruct((R, L), x.dtype),
        grid=grid,
        in_specs=[pl.BlockSpec((r_tile, l_tile), lambda i, j: (i, j)),
                  pl.BlockSpec((r_tile, 2), lambda i, j: (i, 0))],
        out_specs=pl.BlockSpec((r_tile, l_tile), lambda i, j: (i, j)),
        compiler_params=pltpu.CompilerParams(
            dimension_semantics=("parallel", "parallel"),
            vmem_limit_bytes=_VMEM_LIMIT),
        cost_estimate=pl.CostEstimate(
            flops=2 * R * L, transcendentals=0,
            bytes_accessed=2 * R * L * itemsize + R * 2 * 4),
    )(x2, ss)

    return y2.reshape(N, C, H, W), mean, var


def momentum_bn_reference(x, source_mean, source_var, weight, bias,
                          *, momentum, eps):
    xf = x.astype(jnp.float32)
    b_mean = jnp.mean(xf, axis=(0, 2, 3))
    b_var = jnp.var(xf, axis=(0, 2, 3))              # biased (ddof=0)
    mean = (1.0 - momentum) * source_mean + momentum * b_mean
    var = (1.0 - momentum) * source_var + momentum * b_var
    m = mean.reshape(1, -1, 1, 1)
    v = var.reshape(1, -1, 1, 1)
    y = (xf - m) / jnp.sqrt(v + eps)
    y = y * weight.reshape(1, -1, 1, 1) + bias.reshape(1, -1, 1, 1)
    return y.astype(x.dtype), mean, var


def _run_case(N, C, H, W, seed):
    momentum, eps = 0.1, 1e-5
    key = jax.random.PRNGKey(seed)
    kx, km, kv, kw, kb = jax.random.split(key, 5)
    x = jax.random.normal(kx, (N, C, H, W), dtype=jnp.float32)
    source_mean = 0.1 * jax.random.normal(km, (C,), dtype=jnp.float32)
    source_var = 1.0 + 0.1 * jax.random.uniform(kv, (C,), dtype=jnp.float32)
    weight = 1.0 + 0.1 * jax.random.normal(kw, (C,), dtype=jnp.float32)
    bias = 0.1 * jax.random.normal(kb, (C,), dtype=jnp.float32)

    y, new_mean, new_var = momentum_bn_forward(
        x, source_mean, source_var, weight, bias, momentum=momentum, eps=eps)
    jax.block_until_ready((y, new_mean, new_var))

    y_ref, mean_ref, var_ref = momentum_bn_reference(
        x, source_mean, source_var, weight, bias, momentum=momentum, eps=eps)

    assert jnp.allclose(y, y_ref, atol=1e-4, rtol=1e-4), "y mismatch"
    assert jnp.allclose(new_mean, mean_ref, atol=1e-4, rtol=1e-4), "mean mismatch"
    assert jnp.allclose(new_var, var_ref, atol=1e-4, rtol=1e-4), "var mismatch"


if __name__ == "__main__":
    # jax.random.PRNGKey(0): small shape consistent with BatchNorm2d input;
    # exercises the fused single-kernel path.
    _run_case(2, 4, 16, 16, seed=0)
    # Moderate, non-128-aligned shape: exercises the tiled two-pass path
    # (ragged lane edge masking, multi-block accumulation, 2 row blocks).
    _run_case(4, 16, 145, 145, seed=1)
    print("KERNEL_OK")
</pallas_src>

<mosaic_0001>
module attributes {stable_mosaic.version = 11 : i64} {
  func.func @kernel(%arg0: i32, %arg1: memref<2x4x256xf32, #tpu.memory_space<vmem>>, %arg2: memref<4x4x1xf32, #tpu.memory_space<vmem>>, %arg3: memref<2x4x256xf32, #tpu.memory_space<vmem>>, %arg4: memref<2x4x1xf32, #tpu.memory_space<vmem>>) attributes {dimension_semantics = [#tpu.dimension_semantics<arbitrary>], iteration_bounds = array<i64: 1>, scalar_prefetch = 0 : i64, scratch_operands = 0 : i64, tpu.core_type = #tpu.core_type<tc>, window_params = [{pipeline_mode = #tpu.pipeline_mode<synchronous>, transform_indices = @transform_0, window_bounds = array<i64: 2, 4, 256>}, {pipeline_mode = #tpu.pipeline_mode<synchronous>, transform_indices = @transform_1, window_bounds = array<i64: 4, 4, 1>}, {pipeline_mode = #tpu.pipeline_mode<synchronous>, transform_indices = @transform_2, window_bounds = array<i64: 2, 4, 256>}, {pipeline_mode = #tpu.pipeline_mode<synchronous>, transform_indices = @transform_3, window_bounds = array<i64: 2, 4, 1>}]} {
    %c0 = arith.constant 0 : index
    %c0_0 = arith.constant 0 : index
    %c0_1 = arith.constant 0 : index
    %0 = vector.load %arg1[%c0, %c0_0, %c0_1] : memref<2x4x256xf32, #tpu.memory_space<vmem>>, vector<2x4x256xf32>
    %c0_2 = arith.constant 0 : index
    %c0_3 = arith.constant 0 : index
    %c0_4 = arith.constant 0 : index
    %1 = vector.load %arg2[%c0_2, %c0_3, %c0_4] : memref<4x4x1xf32, #tpu.memory_space<vmem>>, vector<4x4x1xf32>
    %2 = vector.extract_strided_slice %1 {offsets = [0, 0, 0], sizes = [1, 4, 1], strides = [1, 1, 1]} : vector<4x4x1xf32> to vector<1x4x1xf32>
    %3 = vector.extract_strided_slice %1 {offsets = [1, 0, 0], sizes = [1, 4, 1], strides = [1, 1, 1]} : vector<4x4x1xf32> to vector<1x4x1xf32>
    %4 = vector.extract_strided_slice %1 {offsets = [2, 0, 0], sizes = [1, 4, 1], strides = [1, 1, 1]} : vector<4x4x1xf32> to vector<1x4x1xf32>
    %5 = vector.extract_strided_slice %1 {offsets = [3, 0, 0], sizes = [1, 4, 1], strides = [1, 1, 1]} : vector<4x4x1xf32> to vector<1x4x1xf32>
    %6 = vector.broadcast %2 : vector<1x4x1xf32> to vector<2x4x256xf32>
    %7 = arith.subf %0, %6 : vector<2x4x256xf32>
    %cst = arith.constant dense<0.000000e+00> : vector<2x4xf32>
    %8 = vector.multi_reduction <add>, %7, %cst [2] : vector<2x4x256xf32> to vector<2x4xf32>
    %9 = vector.shape_cast %8 : vector<2x4xf32> to vector<2x4x1xf32>
    %cst_5 = arith.constant dense<0.000000e+00> : vector<4x1xf32>
    %10 = vector.multi_reduction <add>, %9, %cst_5 [0] : vector<2x4x1xf32> to vector<4x1xf32>
    %11 = vector.shape_cast %10 : vector<4x1xf32> to vector<1x4x1xf32>
    %cst_6 = arith.constant 5.120000e+02 : f32
    %12 = vector.broadcast %cst_6 : f32 to vector<1x4x1xf32>
    %13 = arith.divf %11, %12 : vector<1x4x1xf32>
    %14 = arith.mulf %7, %7 : vector<2x4x256xf32>
    %cst_7 = arith.constant dense<0.000000e+00> : vector<2x4xf32>
    %15 = vector.multi_reduction <add>, %14, %cst_7 [2] : vector<2x4x256xf32> to vector<2x4xf32>
    %16 = vector.shape_cast %15 : vector<2x4xf32> to vector<2x4x1xf32>
    %cst_8 = arith.constant dense<0.000000e+00> : vector<4x1xf32>
    %17 = vector.multi_reduction <add>, %16, %cst_8 [0] : vector<2x4x1xf32> to vector<4x1xf32>
    %18 = vector.shape_cast %17 : vector<4x1xf32> to vector<1x4x1xf32>
    %cst_9 = arith.constant 5.120000e+02 : f32
    %19 = vector.broadcast %cst_9 : f32 to vector<1x4x1xf32>
    %20 = arith.divf %18, %19 : vector<1x4x1xf32>
    %21 = arith.addf %2, %13 : vector<1x4x1xf32>
    %22 = arith.mulf %13, %13 : vector<1x4x1xf32>
    %23 = arith.subf %20, %22 : vector<1x4x1xf32>
    %cst_10 = arith.constant 0.899999976 : f32
    %24 = vector.broadcast %cst_10 : f32 to vector<1x4x1xf32>
    %25 = arith.mulf %24, %2 : vector<1x4x1xf32>
    %cst_11 = arith.constant 1.000000e-01 : f32
    %26 = vector.broadcast %cst_11 : f32 to vector<1x4x1xf32>
    %27 = arith.mulf %26, %21 : vector<1x4x1xf32>
    %28 = arith.addf %25, %27 : vector<1x4x1xf32>
    %cst_12 = arith.constant 0.899999976 : f32
    %29 = vector.broadcast %cst_12 : f32 to vector<1x4x1xf32>
    %30 = arith.mulf %29, %3 : vector<1x4x1xf32>
    %cst_13 = arith.constant 1.000000e-01 : f32
    %31 = vector.broadcast %cst_13 : f32 to vector<1x4x1xf32>
    %32 = arith.mulf %31, %23 : vector<1x4x1xf32>
    %33 = arith.addf %30, %32 : vector<1x4x1xf32>
    %cst_14 = arith.constant 9.99999974E-6 : f32
    %34 = vector.broadcast %cst_14 : f32 to vector<1x4x1xf32>
    %35 = arith.addf %33, %34 : vector<1x4x1xf32>
    %36 = math.rsqrt %35 : vector<1x4x1xf32>
    %37 = arith.mulf %36, %4 : vector<1x4x1xf32>
    %38 = arith.mulf %28, %37 : vector<1x4x1xf32>
    %39 = arith.subf %5, %38 : vector<1x4x1xf32>
    %40 = vector.broadcast %37 : vector<1x4x1xf32> to vector<2x4x256xf32>
    %41 = arith.mulf %0, %40 : vector<2x4x256xf32>
    %42 = vector.broadcast %39 : vector<1x4x1xf32> to vector<2x4x256xf32>
    %43 = arith.addf %41, %42 : vector<2x4x256xf32>
    %c0_15 = arith.constant 0 : index
    %c0_16 = arith.constant 0 : index
    %c0_17 = arith.constant 0 : index
    %44 = vector.load %arg3[%c0_15, %c0_16, %c0_17] : memref<2x4x256xf32, #tpu.memory_space<vmem>>, vector<2x4x256xf32>
    tpu.vector_store %arg3[%c0_15, %c0_16, %c0_17], %43 {strides = array<i32>} : memref<2x4x256xf32, #tpu.memory_space<vmem>>, vector<2x4x256xf32>,
    %c0_18 = arith.constant 0 : index
    %c0_19 = arith.constant 0 : index
    %c0_20 = arith.constant 0 : index
    %45 = vector.load %arg4[%c0_18, %c0_19, %c0_20] : memref<2x4x1xf32, #tpu.memory_space<vmem>>, vector<1x4x1xf32>
    tpu.vector_store %arg4[%c0_18, %c0_19, %c0_20], %28 {strides = array<i32>} : memref<2x4x1xf32, #tpu.memory_space<vmem>>, vector<1x4x1xf32>,
    %c1 = arith.constant 1 : index
    %c0_21 = arith.constant 0 : index
    %c0_22 = arith.constant 0 : index
    %46 = vector.load %arg4[%c1, %c0_21, %c0_22] : memref<2x4x1xf32, #tpu.memory_space<vmem>>, vector<1x4x1xf32>
    tpu.vector_store %arg4[%c1, %c0_21, %c0_22], %33 {strides = array<i32>} : memref<2x4x1xf32, #tpu.memory_space<vmem>>, vector<1x4x1xf32>,
    return
  }
  func.func @transform_0(%arg0: i32) -> (i32, i32, i32) {
    %c0_i32 = arith.constant 0 : i32
    %c0_i32_0 = arith.constant 0 : i32
    %c0_i32_1 = arith.constant 0 : i32
    %c0_i32_2 = arith.constant 0 : i32
    return %c0_i32, %c0_i32_0, %c0_i32_1 : i32, i32, i32
  }
  func.func @transform_1(%arg0: i32) -> (i32, i32, i32) {
    %c0_i32 = arith.constant 0 : i32
    %c0_i32_0 = arith.constant 0 : i32
    %c0_i32_1 = arith.constant 0 : i32
    %c0_i32_2 = arith.constant 0 : i32
    return %c0_i32, %c0_i32_0, %c0_i32_1 : i32, i32, i32
  }
  func.func @transform_2(%arg0: i32) -> (i32, i32, i32) {
    %c0_i32 = arith.constant 0 : i32
    %c0_i32_0 = arith.constant 0 : i32
    %c0_i32_1 = arith.constant 0 : i32
    %c0_i32_2 = arith.constant 0 : i32
    return %c0_i32, %c0_i32_0, %c0_i32_1 : i32, i32, i32
  }
  func.func @transform_3(%arg0: i32) -> (i32, i32, i32) {
    %c0_i32 = arith.constant 0 : i32
    %c0_i32_0 = arith.constant 0 : i32
    %c0_i32_1 = arith.constant 0 : i32
    %c0_i32_2 = arith.constant 0 : i32
    return %c0_i32, %c0_i32_0, %c0_i32_1 : i32, i32, i32
  }
}

</mosaic_0001>

<bundles_post_ra>
// kernel: tpu_custom_call.1
= control target key start
LH: loop header
LB: loop body
LE: loop exit
PB: predicated region body
PF: predicated region fallthrough
CT: control target
= control target key end

     0   :  { %v178_v1 = vmov 0   ;;  %s255_s0 = inlined_call_operand.vmem [shape: f32[2,4,256], index: 0, kind: input, shape index: {}]   ;;  %s256_s1 = inlined_call_operand.vmem [shape: f32[4,4,1], index: 1, kind: input, shape index: {}]   ;;  %s257_s2 = inlined_call_operand.hbm [shape: f32[2,4,256], index: 2, kind: output, shape index: {0}]   ;;  %s258_s3 = inlined_call_operand.vmem [shape: f32[2,4,1], index: 3, kind: output, shape index: {1}]  }
   0x1   :  { %v16_v0 = vld [vmem:[%s256_s1] sm:$0xf]  ;;  %152 = vset.pattern.permute.xlu0 %v178_v1  ;;  %153 = vset.pattern.permute.xlu1 %v178_v1 }
   0x2   :  { %9 = vsyncpa [#allocation3], 0  ;;  %22 = vperm.xlu0 %152, %v16_v0   ;;  %v179_v2 = vmov 839922192   ;;  %v27_v4 = vlaneseq  ;;  %v211_v9 = vld [vmem:[%s255_s0] sm:$0xff]  ;;  %v216_v10 = vld [vmem:[%s255_s0 + $0x8] sm:$0xff] }
   0x3   :  { %v25_v3 = vunpack.c.l.s4 %v179_v2  ;;  %vm40_vm0 = vcmask 1043456   ;;  %v81_v39 = vmul.f32 0.9, %v16_v0  ;;  %vm122_vm1 = vcmask 3072   ;;  %v17_v47 = vld [vmem:[%s256_s1 + $0x4] sm:$0xf] }
   0x4   :  { %v28_v6 = vshrl.u32 %v27_v4, 7  ;;  %v84_v50 = vmul.f32 0.9, %v17_v47  ;;  %v18_v55 = vld [vmem:[%s256_s1 + $0x8] sm:$0xf] }
   0x5   :  { %v26_v5 = vunpack.c.0.s8 %v25_v3  ;;  %v19_v58 = vld [vmem:[%s256_s1 + $0xc] sm:$0xf] }
   0x7   :  { %v206_v7 = vsub.s32 %v26_v5, %v28_v6 }
  0x7d   :  { %v23_v8 = vpop.permute.xlu0 %22 }
  0x7e   :  { %v30_v11 = vrot.slane %v23_v8, %v206_v7 }
  0x80   :  { %v32_v12 = vsub.f32 %v211_v9, %v30_v11  ;;  %v33_v13 = vsub.f32 %v216_v10, %v30_v11 }
  0x82   :  { %v37_v14 = vcombine.high %v33_v13, %v33_v13  ;;  %v36_v15 = vcombine.high %v32_v12, %v32_v12  ;;  %v56_v16 = vmul.f32 %v32_v12, %v32_v12  ;;  %v57_v17 = vmul.f32 %v33_v13, %v33_v13 }
  0x83   :  { %v46_v18 = vsel %vm40_vm0, %v33_v13, 0.0  ;;  %v41_v20 = vsel %vm40_vm0, %v32_v12, 0.0 }
  0x84   :  { %v47_v19 = vsel %vm40_vm0, %v37_v14, 0.0  ;;  %v42_v21 = vsel %vm40_vm0, %v36_v15, 0.0  ;;  %v60_v24 = vcombine.high %v56_v16, %v56_v16  ;;  %v61_v25 = vcombine.high %v57_v17, %v57_v17 }
  0x85   :  { %v48_v22 = vadd.f32 %v47_v19, %v46_v18  ;;  %v43_v23 = vadd.f32 %v42_v21, %v41_v20  ;;  %v64_v27 = vsel %vm40_vm0, %v56_v16, 0.0  ;;  %v69_v30 = vsel %vm40_vm0, %v57_v17, 0.0 }
  0x86   :  { %v65_v26 = vsel %vm40_vm0, %v60_v24, 0.0  ;;  %v70_v29 = vsel %vm40_vm0, %v61_v25, 0.0 }
  0x87   :  { %49 = vadd.xlane.f32.xlu1 %v48_v22  ;;  %44 = vadd.xlane.f32.xlu0 %v43_v23  ;;  %v66_v28 = vadd.f32 %v65_v26, %v64_v27  ;;  %v71_v31 = vadd.f32 %v70_v29, %v69_v30 }
  0x8b   :  { %67 = vadd.xlane.f32.xlu1 %v66_v28 }
  0x8f   :  { %72 = vadd.xlane.f32.xlu1 %v71_v31 }
 0x110   :  { %v50_v32 = vpop.xlane.xlu1 %49  ;;  %v45_v33 = vpop.xlane.xlu0 %44 }
 0x111   :  { %v52_v34 = vsel %vm40_vm0, %v50_v32, 0.0  ;;  %v51_v35 = vsel %vm40_vm0, %v45_v33, 0.0 }
 0x112   :  { %v53_v36 = vadd.f32 %v52_v34, %v51_v35 }
 0x114   :  { %v55_v37 = vmul.f32 0.001953125, %v53_v36  ;;  %v68_v38 = vpop.xlane.xlu1 %67 }
 0x115   :  { %v74_v43 = vsel %vm40_vm0, %v68_v38, 0.0 }
 0x116   :  { %v78_v40 = vadd.f32 %v55_v37, %v16_v0  ;;  %v79_v48 = vmul.f32 %v55_v37, %v55_v37 }
 0x118   :  { %v82_v41 = vmul.f32 0.1, %v78_v40  ;;  %v73_v42 = vpop.xlane.xlu1 %72 }
 0x119   :  { %v75_v44 = vsel %vm40_vm0, %v73_v42, 0.0 }
 0x11a   :  { %v83_v45 = vadd.f32 %v82_v41, %v81_v39  ;;  %v76_v46 = vadd.f32 %v75_v44, %v74_v43 }
 0x11c   :  { %123 = vst.msk [vmem:[%s258_s3] sm:$0xf] %vm122_vm1, %v83_v45  ;;  %v77_v49 = vmul.f32 0.001953125, %v76_v46 }
 0x11e   :  { %v80_v51 = vsub.f32 %v77_v49, %v79_v48 }
 0x120   :  { %v85_v52 = vmul.f32 0.1, %v80_v51 }
 0x122   :  { %v86_v53 = vadd.f32 %v85_v52, %v84_v50 }
 0x124   :  { %v87_v54 = vadd.f32 1e-05, %v86_v53  ;;  %146 = vst.msk [vmem:[%s258_s3 + $0x4] sm:$0xf] %vm122_vm1, %v86_v53  ;;  %s180_s3 = smov [#allocation2]  }
 0x125   :  { %s131_s27 = sshll.u32 %s180_s3, 4  ;;  %s132_s27 = int_to_ptr.vmem [resolvable:$true] %s131_s27 }
 0x126   :  { %154 = vrsqrt.f32 %v87_v54  ;;  %s156_s1 = scalar_lea.vmem %s132_s27, 256  ;;  %p161_p1 = scmp.lt.s32.totalorder %s132_s27, %s132_s27 }
 0x127   :  { %p157_p0 = scmp.ne.s32.totalorder %s132_s27, %s156_s1  ;;  %p162_p2 = scmp.lt.s32.totalorder %s156_s1, %s156_s1 }
 0x129   :  { %p163_p3 = por %p162_p2, %p161_p1 }
 0x12b   :  { %p164_p4 = pnand %p163_p3, %p157_p0 }
 0x133   :  { %v155_v56 = vpop.eup %154 }
 0x134   :  { %v89_v57 = vmul.f32 %v155_v56, %v18_v55 }
 0x136   :  { %94 = vperm.xlu1 %153, %v89_v57   ;;  %v90_v59 = vmul.f32 %v89_v57, %v83_v45 }
 0x138   :  { %v91_v60 = vsub.f32 %v19_v58, %v90_v59 }
 0x13a   :  { %108 = vperm.xlu1 %153, %v91_v60  }
 0x1b1   :  { %v95_v61 = vpop.permute.xlu1 %94 }
 0x1b2   :  { %v102_v62 = vrot.slane %v95_v61, %v206_v7 }
 0x1b4   :  { %v104_v0 = vmul.f32 %v102_v62, %v211_v9  ;;  %v105_v1 = vmul.f32 %v102_v62, %v216_v10 }
 0x1b5   :  { %v109_v63 = vpop.permute.xlu1 %108 }
 0x1b6   :  { %v116_v2 = vrot.slane %v109_v63, %v206_v7 }
 0x1b8   :  { %v118_v3 = vadd.f32 %v116_v2, %v104_v0  ;;  %v119_v4 = vadd.f32 %v116_v2, %v105_v1 }
 0x1ba   :  { %120 = vst [vmem:[#allocation2] sm:$0xff] %v118_v3  ;;  %121 = vst [vmem:[#allocation2 + $0x8] sm:$0xff] %v119_v4 }
 0x1bb   :  { %167 = shalt.err (!%p164_p4)
}
 0x1bc   :  { %s181_s28 = smov 128   ;;  %s182_s29 = smov 8  }
 0x1bd   :  { %137 = dma.vmem_to_hbm [thread:$0]  %s132_s27, 256, %s257_s2, [#allocation3], %s181_s28, %s181_s28, %s182_s29  }
 0x1be   :  { %176 = dma.done.wait [#allocation3], 256  }
 0x1bf   :  { %177 = vsyncadd [#allocation3], 4294967040 }
 0x1c0   :  { %145 = vsyncpa [#allocation3], 1 }

</bundles_post_ra>
